<compile_context>
chip_gen: v6e
topology: v6e:2x2x1
jax: 0.10.0
libtpu: 0.0.40
codegen_flags: <defaults>
</compile_context>

<pallas_src>
import functools
import math

import jax
import jax.numpy as jnp
from jax.experimental import pallas as pl
from jax.experimental.pallas import tpu as pltpu

D_IN, D_H1, D_H2, D_OUT = 447, 256, 64, 3
D_H3_PAD = 128           # w3/b3 zero-padded to a full lane/MXU width
_MIN_TILE_M = 256        # don't shrink tiles below this when splitting for 2 TCs
_MAX_TILE_M = 4096       # keeps working set far below v7x's 64 MiB VMEM


def _round_up(x, m):
    return (x + m - 1) // m * m


def _cdiv(a, b):
    return -(-a // b)


# ------------------------------------------------------------------ in-kernel helpers
def _sigmoid(x):
    return 1.0 / (1.0 + jnp.exp(-x))


def _softplus(x):
    # numerically stable softplus (== F.softplus with beta=1)
    return jnp.maximum(x, 0.0) + jnp.log1p(jnp.exp(-jnp.abs(x)))


# ------------------------------------------------------------------------ fused kernel
def _decoder_kernel(x_ref, w1_ref, b1_ref, w2_ref, b2_ref, w3_ref, b3_ref, o_ref):
    # x_ref: (tm, 447) f32; w*: bf16; b*: f32; o_ref: (tm, 3) f32.
    x = x_ref[...].astype(jnp.bfloat16)                                 # cast in VMEM
    h = jnp.dot(x, w1_ref[...], preferred_element_type=jnp.float32) + b1_ref[...]
    h = jnp.maximum(h, 0.0)
    h = jnp.dot(h.astype(jnp.bfloat16), w2_ref[...],
                preferred_element_type=jnp.float32) + b2_ref[...]
    h = jnp.maximum(h, 0.0)
    y = jnp.dot(h.astype(jnp.bfloat16), w3_ref[...],
                preferred_element_type=jnp.float32) + b3_ref[...]       # (tm, 128)
    # torch.stack((softplus(y0), sigmoid(y1), softplus(y2)), dim=2) keeps column order;
    # padded columns (3..127) are exactly 0 -> finite, and never stored.
    col = jax.lax.broadcasted_iota(jnp.int32, y.shape, 1)
    z = jnp.where(col == 1, _sigmoid(y), _softplus(y))
    o_ref[...] = z[:, :D_OUT]


# ---------------------------------------------------------------------------- wrapper
def _choose_tile_m(M, tile_m):
    tile_m = max(16, min(tile_m, _MAX_TILE_M))
    steps = _cdiv(M, tile_m)
    # v7x has two TensorCores: with "parallel" semantics make sure there are at
    # least 2 grid steps whenever M is large enough to split.
    if steps < 2 and M >= 2 * _MIN_TILE_M:
        steps = 2
    return _round_up(_cdiv(M, steps), 16)


def decoder_forward(params, x, *, tile_m=2048):
    """x: (B, T, 447) f32 -> (B, T, 3) f32."""
    w1, b1, w2, b2, w3, b3 = params
    B, T, D = x.shape
    assert D == D_IN, D
    M = B * T

    xm = x.reshape(M, D_IN)                     # view only; stays f32 in HBM
    tm = _choose_tile_m(M, tile_m)
    grid_m = _cdiv(M, tm)                       # Pallas masks the ragged last block

    weight_bytes = 2 * (D_IN * D_H1 + D_H1 * D_H2 + D_H2 * D_H3_PAD) \
        + 4 * (D_H1 + D_H2 + D_H3_PAD)
    cost = pl.CostEstimate(
        flops=2 * M * (D_IN * D_H1 + D_H1 * D_H2 + D_H2 * D_H3_PAD),
        transcendentals=2 * M * D_H3_PAD,
        bytes_accessed=M * D_IN * 4 + M * D_OUT * 4 + weight_bytes,
    )

    out = pl.pallas_call(
        _decoder_kernel,
        out_shape=jax.ShapeDtypeStruct((M, D_OUT), jnp.float32),
        grid=(grid_m,),
        in_specs=[
            pl.BlockSpec((tm, D_IN), lambda i: (i, 0)),        # row tile (pipelined)
            pl.BlockSpec((D_IN, D_H1), lambda i: (0, 0)),      # weights: constant index
            pl.BlockSpec((1, D_H1), lambda i: (0, 0)),         #  -> resident in VMEM
            pl.BlockSpec((D_H1, D_H2), lambda i: (0, 0)),
            pl.BlockSpec((1, D_H2), lambda i: (0, 0)),
            pl.BlockSpec((D_H2, D_H3_PAD), lambda i: (0, 0)),
            pl.BlockSpec((1, D_H3_PAD), lambda i: (0, 0)),
        ],
        out_specs=pl.BlockSpec((tm, D_OUT), lambda i: (i, 0)),
        compiler_params=pltpu.CompilerParams(
            dimension_semantics=("parallel",),                 # shard rows across TCs
            vmem_limit_bytes=48 * 1024 * 1024,
        ),
        cost_estimate=cost,
    )(xm, w1, b1, w2, b2, w3, b3)

    return out.reshape(B, T, D_OUT)


# --------------------------------------------------------------------------- reference
def decoder_reference(params, x):
    """Pure-JAX reference mirroring the kernel's bf16-matmul / f32-accumulate recipe."""
    w1, b1, w2, b2, w3, b3 = params
    B, T, _ = x.shape
    xb = x.reshape(B * T, D_IN).astype(jnp.bfloat16).astype(jnp.float32)
    h = jnp.maximum(xb @ w1.astype(jnp.float32) + b1, 0.0)
    h = jnp.maximum(h.astype(jnp.bfloat16).astype(jnp.float32)
                    @ w2.astype(jnp.float32) + b2, 0.0)
    y = (h.astype(jnp.bfloat16).astype(jnp.float32)
         @ w3.astype(jnp.float32) + b3)[:, :D_OUT]
    out = jnp.stack(
        [jax.nn.softplus(y[:, 0]), jax.nn.sigmoid(y[:, 1]), jax.nn.softplus(y[:, 2])],
        axis=1)
    return out.reshape(B, T, D_OUT)


# ------------------------------------------------------------------------------ params
def init_params(key):
    """PyTorch nn.Linear default init: U(-1/sqrt(fan_in), 1/sqrt(fan_in)).
    Weights stored transposed (din, dout) in bf16; biases (1, dout) in f32.
    Layer-3 weight/bias zero-padded to 128 output columns (cols 3..127 dead)."""
    def lin(kk, din, dout, dout_pad=None):
        kw, kb = jax.random.split(kk)
        s = 1.0 / math.sqrt(din)
        w = jax.random.uniform(kw, (din, dout), jnp.float32, -s, s)
        b = jax.random.uniform(kb, (1, dout), jnp.float32, -s, s)
        if dout_pad is not None and dout_pad > dout:
            w = jnp.pad(w, ((0, 0), (0, dout_pad - dout)))
            b = jnp.pad(b, ((0, 0), (0, dout_pad - dout)))
        return w.astype(jnp.bfloat16), b

    k1, k2, k3 = jax.random.split(key, 3)
    w1, b1 = lin(k1, D_IN, D_H1)
    w2, b2 = lin(k2, D_H1, D_H2)
    w3, b3 = lin(k3, D_H2, D_OUT, dout_pad=D_H3_PAD)
    return (w1, b1, w2, b2, w3, b3)


# -------------------------------------------------------------------------------- main
if __name__ == "__main__":
    key = jax.random.PRNGKey(0)
    kp, kx, kx2 = jax.random.split(key, 3)
    params = init_params(kp)

    # ---- exact-tile case
    B, T = 2, 8
    x = jax.random.normal(kx, (B, T, D_IN), jnp.float32)
    fwd = jax.jit(decoder_forward)
    out = jax.block_until_ready(fwd(params, x))

    assert out.shape == (B, T, D_OUT), out.shape
    assert bool(jnp.all(jnp.isfinite(out)))
    # column 1 is sigmoid, columns 0/2 are softplus
    assert bool(jnp.all(out[..., 1] > 0.0)) and bool(jnp.all(out[..., 1] < 1.0))
    assert bool(jnp.all(out[..., 0] > 0.0)) and bool(jnp.all(out[..., 2] > 0.0))
    ref = decoder_reference(params, x)
    max_err = float(jnp.max(jnp.abs(out - ref)))
    assert max_err < 2e-2, f"max abs err vs reference: {max_err}"

    # ---- ragged-M case: partial last grid block relies on Pallas output masking
    B2, T2 = 2, 13
    x2 = jax.random.normal(kx2, (B2, T2, D_IN), jnp.float32)
    fwd_ragged = jax.jit(functools.partial(decoder_forward, tile_m=16))
    out2 = jax.block_until_ready(fwd_ragged(params, x2))
    ref2 = decoder_reference(params, x2)
    assert out2.shape == (B2, T2, D_OUT), out2.shape
    max_err2 = float(jnp.max(jnp.abs(out2 - ref2)))
    assert max_err2 < 2e-2, f"ragged-M max abs err vs reference: {max_err2}"

    print("KERNEL_OK")
</pallas_src>

<mosaic_0001>
module attributes {stable_mosaic.version = 11 : i64} {
  func.func @_decoder_kernel(%arg0: i32, %arg1: memref<16x447xf32, #tpu.memory_space<vmem>>, %arg2: memref<447x256xbf16, #tpu.memory_space<vmem>>, %arg3: memref<1x256xf32, #tpu.memory_space<vmem>>, %arg4: memref<256x64xbf16, #tpu.memory_space<vmem>>, %arg5: memref<1x64xf32, #tpu.memory_space<vmem>>, %arg6: memref<64x128xbf16, #tpu.memory_space<vmem>>, %arg7: memref<1x128xf32, #tpu.memory_space<vmem>>, %arg8: memref<16x3xf32, #tpu.memory_space<vmem>>) attributes {dimension_semantics = [#tpu.dimension_semantics<parallel>], iteration_bounds = array<i64: 1>, scalar_prefetch = 0 : i64, scratch_operands = 0 : i64, tpu.core_type = #tpu.core_type<tc>, window_params = [{transform_indices = @transform_0, window_bounds = array<i64: 16, 447>}, {pipeline_mode = #tpu.pipeline_mode<synchronous>, transform_indices = @transform_1, window_bounds = array<i64: 447, 256>}, {pipeline_mode = #tpu.pipeline_mode<synchronous>, transform_indices = @transform_2, window_bounds = array<i64: 1, 256>}, {pipeline_mode = #tpu.pipeline_mode<synchronous>, transform_indices = @transform_3, window_bounds = array<i64: 256, 64>}, {pipeline_mode = #tpu.pipeline_mode<synchronous>, transform_indices = @transform_4, window_bounds = array<i64: 1, 64>}, {pipeline_mode = #tpu.pipeline_mode<synchronous>, transform_indices = @transform_5, window_bounds = array<i64: 64, 128>}, {pipeline_mode = #tpu.pipeline_mode<synchronous>, transform_indices = @transform_6, window_bounds = array<i64: 1, 128>}, {transform_indices = @transform_7, window_bounds = array<i64: 16, 3>}]} {
    %c0 = arith.constant 0 : index
    %c0_0 = arith.constant 0 : index
    %0 = vector.load %arg1[%c0, %c0_0] : memref<16x447xf32, #tpu.memory_space<vmem>>, vector<16x447xf32>
    %1 = arith.truncf %0 : vector<16x447xf32> to vector<16x447xbf16>
    %c0_1 = arith.constant 0 : index
    %c0_2 = arith.constant 0 : index
    %2 = vector.load %arg2[%c0_1, %c0_2] : memref<447x256xbf16, #tpu.memory_space<vmem>>, vector<447x256xbf16>
    %cst = arith.constant dense<0.000000e+00> : vector<16x256xf32>
    %3 = tpu.matmul %1, %2, %cst {dimension_numbers = #tpu.dot_dimension_numbers<[1], [0], [0], [1], [0, 0, 1, 1], [], []>} : vector<16x447xbf16>, vector<447x256xbf16>, vector<16x256xf32> -> vector<16x256xf32>
    %c0_3 = arith.constant 0 : index
    %c0_4 = arith.constant 0 : index
    %4 = vector.load %arg3[%c0_3, %c0_4] : memref<1x256xf32, #tpu.memory_space<vmem>>, vector<1x256xf32>
    %5 = vector.broadcast %4 : vector<1x256xf32> to vector<16x256xf32>
    %6 = arith.addf %3, %5 : vector<16x256xf32>
    %cst_5 = arith.constant 0.000000e+00 : f32
    %7 = vector.broadcast %cst_5 : f32 to vector<16x256xf32>
    %8 = arith.maximumf %6, %7 : vector<16x256xf32>
    %9 = arith.truncf %8 : vector<16x256xf32> to vector<16x256xbf16>
    %c0_6 = arith.constant 0 : index
    %c0_7 = arith.constant 0 : index
    %10 = vector.load %arg4[%c0_6, %c0_7] : memref<256x64xbf16, #tpu.memory_space<vmem>>, vector<256x64xbf16>
    %cst_8 = arith.constant dense<0.000000e+00> : vector<16x64xf32>
    %11 = tpu.matmul %9, %10, %cst_8 {dimension_numbers = #tpu.dot_dimension_numbers<[1], [0], [0], [1], [0, 0, 1, 1], [], []>} : vector<16x256xbf16>, vector<256x64xbf16>, vector<16x64xf32> -> vector<16x64xf32>
    %c0_9 = arith.constant 0 : index
    %c0_10 = arith.constant 0 : index
    %12 = vector.load %arg5[%c0_9, %c0_10] : memref<1x64xf32, #tpu.memory_space<vmem>>, vector<1x64xf32>
    %13 = vector.broadcast %12 : vector<1x64xf32> to vector<16x64xf32>
    %14 = arith.addf %11, %13 : vector<16x64xf32>
    %cst_11 = arith.constant 0.000000e+00 : f32
    %15 = vector.broadcast %cst_11 : f32 to vector<16x64xf32>
    %16 = arith.maximumf %14, %15 : vector<16x64xf32>
    %17 = arith.truncf %16 : vector<16x64xf32> to vector<16x64xbf16>
    %c0_12 = arith.constant 0 : index
    %c0_13 = arith.constant 0 : index
    %18 = vector.load %arg6[%c0_12, %c0_13] : memref<64x128xbf16, #tpu.memory_space<vmem>>, vector<64x128xbf16>
    %cst_14 = arith.constant dense<0.000000e+00> : vector<16x128xf32>
    %19 = tpu.matmul %17, %18, %cst_14 {dimension_numbers = #tpu.dot_dimension_numbers<[1], [0], [0], [1], [0, 0, 1, 1], [], []>} : vector<16x64xbf16>, vector<64x128xbf16>, vector<16x128xf32> -> vector<16x128xf32>
    %c0_15 = arith.constant 0 : index
    %c0_16 = arith.constant 0 : index
    %20 = vector.load %arg7[%c0_15, %c0_16] : memref<1x128xf32, #tpu.memory_space<vmem>>, vector<1x128xf32>
    %21 = vector.broadcast %20 : vector<1x128xf32> to vector<16x128xf32>
    %22 = arith.addf %19, %21 : vector<16x128xf32>
    %23 = tpu.iota {dimensions = array<i32: 1>} : vector<16x128xi32>
    %c1_i32 = arith.constant 1 : i32
    %24 = vector.broadcast %c1_i32 : i32 to vector<16x128xi32>
    %25 = arith.cmpi eq, %23, %24 : vector<16x128xi32>
    %cst_17 = arith.constant 0.000000e+00 : f32
    %26 = vector.broadcast %cst_17 : f32 to vector<16x128xf32>
    %27 = arith.subf %26, %22 : vector<16x128xf32>
    %28 = math.exp %27 : vector<16x128xf32>
    %cst_18 = arith.constant 1.000000e+00 : f32
    %29 = vector.broadcast %cst_18 : f32 to vector<16x128xf32>
    %30 = arith.addf %29, %28 : vector<16x128xf32>
    %cst_19 = arith.constant 1.000000e+00 : f32
    %31 = vector.broadcast %cst_19 : f32 to vector<16x128xf32>
    %32 = arith.divf %31, %30 : vector<16x128xf32>
    %cst_20 = arith.constant 0.000000e+00 : f32
    %33 = vector.broadcast %cst_20 : f32 to vector<16x128xf32>
    %34 = arith.maximumf %22, %33 : vector<16x128xf32>
    %35 = math.absf %22 : vector<16x128xf32>
    %cst_21 = arith.constant 0.000000e+00 : f32
    %36 = vector.broadcast %cst_21 : f32 to vector<16x128xf32>
    %37 = arith.subf %36, %35 : vector<16x128xf32>
    %38 = math.exp %37 : vector<16x128xf32>
    %39 = math.log1p %38 : vector<16x128xf32>
    %40 = arith.addf %34, %39 : vector<16x128xf32>
    %41 = arith.select %25, %32, %40 : vector<16x128xi1>, vector<16x128xf32>
    %42 = vector.extract_strided_slice %41 {offsets = [0, 0], sizes = [16, 3], strides = [1, 1]} : vector<16x128xf32> to vector<16x3xf32>
    %c0_22 = arith.constant 0 : index
    %c0_23 = arith.constant 0 : index
    %43 = vector.load %arg8[%c0_22, %c0_23] : memref<16x3xf32, #tpu.memory_space<vmem>>, vector<16x3xf32>
    tpu.vector_store %arg8[%c0_22, %c0_23], %42 {strides = array<i32>} : memref<16x3xf32, #tpu.memory_space<vmem>>, vector<16x3xf32>,
    return
  }
  func.func @transform_0(%arg0: i32) -> (i32, i32) {
    %c0_i32 = arith.constant 0 : i32
    %c0_i32_0 = arith.constant 0 : i32
    return %arg0, %c0_i32 : i32, i32
  }
  func.func @transform_1(%arg0: i32) -> (i32, i32) {
    %c0_i32 = arith.constant 0 : i32
    %c0_i32_0 = arith.constant 0 : i32
    %c0_i32_1 = arith.constant 0 : i32
    return %c0_i32, %c0_i32_0 : i32, i32
  }
  func.func @transform_2(%arg0: i32) -> (i32, i32) {
    %c0_i32 = arith.constant 0 : i32
    %c0_i32_0 = arith.constant 0 : i32
    %c0_i32_1 = arith.constant 0 : i32
    return %c0_i32, %c0_i32_0 : i32, i32
  }
  func.func @transform_3(%arg0: i32) -> (i32, i32) {
    %c0_i32 = arith.constant 0 : i32
    %c0_i32_0 = arith.constant 0 : i32
    %c0_i32_1 = arith.constant 0 : i32
    return %c0_i32, %c0_i32_0 : i32, i32
  }
  func.func @transform_4(%arg0: i32) -> (i32, i32) {
    %c0_i32 = arith.constant 0 : i32
    %c0_i32_0 = arith.constant 0 : i32
    %c0_i32_1 = arith.constant 0 : i32
    return %c0_i32, %c0_i32_0 : i32, i32
  }
  func.func @transform_5(%arg0: i32) -> (i32, i32) {
    %c0_i32 = arith.constant 0 : i32
    %c0_i32_0 = arith.constant 0 : i32
    %c0_i32_1 = arith.constant 0 : i32
    return %c0_i32, %c0_i32_0 : i32, i32
  }
  func.func @transform_6(%arg0: i32) -> (i32, i32) {
    %c0_i32 = arith.constant 0 : i32
    %c0_i32_0 = arith.constant 0 : i32
    %c0_i32_1 = arith.constant 0 : i32
    return %c0_i32, %c0_i32_0 : i32, i32
  }
  func.func @transform_7(%arg0: i32) -> (i32, i32) {
    %c0_i32 = arith.constant 0 : i32
    %c0_i32_0 = arith.constant 0 : i32
    return %arg0, %c0_i32 : i32, i32
  }
}

</mosaic_0001>

<bundles_post_ra>
// kernel: decoder_forward.1
= control target key start
LH: loop header
LB: loop body
LE: loop exit
PB: predicated region body
PF: predicated region fallthrough
CT: control target
= control target key end

     0   :  { %12 = vsyncpa [#allocation3], 0  ;;  %s1090_s24 = smov [#allocation2]   ;;  %s1242_s0 = inlined_call_operand.vmem [shape: f32[16,447], index: 0, kind: input, shape index: {}]   ;;  %s1243_s1 = inlined_call_operand.hbm [shape: bf16[447,256], index: 1, kind: input, shape index: {}]   ;;  %s1244_s2 = inlined_call_operand.vmem [shape: f32[1,256], index: 2, kind: input, shape index: {}]   ;;  %s1245_s3 = inlined_call_operand.vmem [shape: bf16[256,64], index: 3, kind: input, shape index: {}]   ;;  %s1246_s4 = inlined_call_operand.vmem [shape: f32[1,64], index: 4, kind: input, shape index: {}]   ;;  %s1247_s5 = inlined_call_operand.vmem [shape: bf16[64,128], index: 5, kind: input, shape index: {}]   ;;  %s1248_s6 = inlined_call_operand.vmem [shape: f32[1,128], index: 6, kind: input, shape index: {}]   ;;  %s1249_s7 = inlined_call_operand.vmem [shape: f32[16,3], index: 7, kind: output, shape index: {}]  }
   0x1   :  { %s20_s25 = sshll.u32 %s1090_s24, 4  ;;  %s21_s25 = int_to_ptr.vmem [resolvable:$true] %s20_s25 }
   0x2   :  { %s1076_s26 = scalar_lea.vmem %s21_s25, 7168  ;;  %p1081_p1 = scmp.lt.s32.totalorder %s21_s25, %s21_s25 }
   0x3   :  { %p1077_p0 = scmp.ne.s32.totalorder %s21_s25, %s1076_s26  ;;  %p1082_p2 = scmp.lt.s32.totalorder %s1076_s26, %s1076_s26 }
   0x5   :  { %p1083_p3 = por %p1082_p2, %p1081_p1 }
   0x7   :  { %p1084_p4 = pnand %p1083_p3, %p1077_p0 }
   0x9   :  { %1087 = shalt.err (!%p1084_p4)
}
   0xa   :  { %s1091_s27 = smov 128   ;;  %s1092_s28 = smov 8  }
   0xb   :  { %26 = dma.hbm_to_vmem [thread:$0]  %s1243_s1, 7168, %s21_s25, [#allocation3], %s1091_s27, %s1091_s27, %s1092_s28  }
   0xc   :  { %1088 = dma.done.wait [#allocation3], 7168  }
   0xd   :  { %1089 = vsyncadd [#allocation3], 4294960128  ;;  %v948_v0 = vld [vmem:[#allocation2 + $0x74] ss:$8 sps:$4 sm:$0xff]   ;;  %v950_v1 = vld [vmem:[#allocation2 + $0x70] ss:$8 sps:$4 sm:$0xff]  }
   0xe   :  { %413 = vmatprep.subr.bf16.mxu0 %v948_v0  ;;  %v951_v2 = vld [vmem:[#allocation2 + $0x64] ss:$8 sps:$4 sm:$0xff]   ;;  %v953_v3 = vld [vmem:[#allocation2 + $0x60] ss:$8 sps:$4 sm:$0xff]   ;;  %v954_v4 = vld [vmem:[#allocation2 + $0x54] ss:$8 sps:$4 sm:$0xff]  }
   0xf   :  { %414 = vmatpush1.bf16.msra.mxu0 %v950_v1  ;;  %v959_v5 = vld [vmem:[#allocation2 + $0x174] ss:$8 sps:$4 sm:$0xff]   ;;  %v962_v6 = vld [vmem:[#allocation2 + $0x170] ss:$8 sps:$4 sm:$0xff]   ;;  %v957_v8 = vld [vmem:[#allocation2 + $0x44] ss:$8 sps:$4 sm:$0xff]  }
  0x10   :  { %415 = vmatprep.subr.bf16.mxu0 %v951_v2  ;;  %v956_v7 = vld [vmem:[#allocation2 + $0x50] ss:$8 sps:$4 sm:$0xff]   ;;  %456 = vmatprep.subr.bf16.mxu1 %v959_v5  ;;  %v965_v9 = vld [vmem:[#allocation2 + $0x164] ss:$8 sps:$4 sm:$0xff]   ;;  %v968_v10 = vld [vmem:[#allocation2 + $0x160] ss:$8 sps:$4 sm:$0xff]  }
  0x11   :  { %457 = vmatpush1.bf16.msra.mxu1 %v962_v6  ;;  %v961_v11 = vld [vmem:[#allocation2 + $0x40] ss:$8 sps:$4 sm:$0xff]   ;;  %v963_v12 = vld [vmem:[#allocation2 + $0x34] ss:$8 sps:$4 sm:$0xff]   ;;  %v974_v14 = vld [vmem:[#allocation2 + $0x150] ss:$8 sps:$4 sm:$0xff]  }
  0x12   :  { %458 = vmatprep.subr.bf16.mxu1 %v965_v9  ;;  %v971_v13 = vld [vmem:[#allocation2 + $0x154] ss:$8 sps:$4 sm:$0xff]   ;;  %v977_v15 = vld [vmem:[#allocation2 + $0x144] ss:$8 sps:$4 sm:$0xff]   ;;  %v967_v16 = vld [vmem:[#allocation2 + $0x30] ss:$8 sps:$4 sm:$0xff]  }
  0x13   :  { %416 = vmatpush1.bf16.msra.mxu0 %v953_v3  ;;  %v969_v17 = vld [vmem:[#allocation2 + $0x24] ss:$8 sps:$4 sm:$0xff]   ;;  %v980_v18 = vld [vmem:[#allocation2 + $0x140] ss:$8 sps:$4 sm:$0xff]   ;;  %v983_v19 = vld [vmem:[#allocation2 + $0x134] ss:$8 sps:$4 sm:$0xff]  }
  0x14   :  { %417 = vmatprep.subr.bf16.mxu0 %v954_v4  ;;  %v973_v20 = vld [vmem:[#allocation2 + $0x20] ss:$8 sps:$4 sm:$0xff]   ;;  %v975_v21 = vld [vmem:[#allocation2 + $0x14] ss:$8 sps:$4 sm:$0xff]   ;;  %v986_v22 = vld [vmem:[#allocation2 + $0x130] ss:$8 sps:$4 sm:$0xff]  }
  0x15   :  { %459 = vmatpush1.bf16.msra.mxu1 %v968_v10  ;;  %v989_v23 = vld [vmem:[#allocation2 + $0x124] ss:$8 sps:$4 sm:$0xff]   ;;  %v979_v24 = vld [vmem:[#allocation2 + $0x10] ss:$8 sps:$4 sm:$0xff]   ;;  %vm403_vm0 = vcmask 1046528   ;;  %vm404_vm1 = vcmask 1047552  }
  0x16   :  { %460 = vmatprep.subr.bf16.mxu1 %v971_v13  ;;  %v981_v25 = vld [vmem:[#allocation2 + $0x4] ss:$8 sps:$4 sm:$0xff]   ;;  %v992_v26 = vld [vmem:[#allocation2 + $0x120] ss:$8 sps:$4 sm:$0xff]   ;;  %v995_v27 = vld [vmem:[#allocation2 + $0x114] ss:$8 sps:$4 sm:$0xff]  }
  0x17   :  { %418 = vmatpush1.bf16.msra.mxu0 %v956_v7  ;;  %v1093_v28 = vmov 65535   ;;  %v985_v30 = vld [vmem:[#allocation2] ss:$8 sps:$4 sm:$0xff]   ;;  %v987_v31 = vld [vmem:[#allocation2 + $0xf4] ss:$8 sps:$4 sm:$0xff]   ;;  %vm399_vm2 = vcmask 515072  }
  0x18   :  { %419 = vmatprep.subr.bf16.mxu0 %v957_v8  ;;  %v405_v29 = vsel %vm403_vm0, 4294967295, %v1093_v28  ;;  %v998_v32 = vld [vmem:[#allocation2 + $0x110] ss:$8 sps:$4 sm:$0xff]   ;;  %v1001_v33 = vld [vmem:[#allocation2 + $0x104] ss:$8 sps:$4 sm:$0xff]   ;;  %vm1095_vm3 = vmmov 0  }
  0x19   :  { %461 = vmatpush1.bf16.msra.mxu1 %v974_v14  ;;  %v1007_v34 = vld [vmem:[#allocation2 + $0x1b4] ss:$8 sps:$4 sm:$0xff]   ;;  %v991_v35 = vld [vmem:[#allocation2 + $0xf0] ss:$8 sps:$4 sm:$0xff]   ;;  %v406_v36 = vsel %vm404_vm1, %v405_v29, 0  ;;  %v42_v48 = vld [vmem:[%s1242_s0 + $0x8] sm:$0xff] }
  0x1a   :  { %462 = vmatprep.subr.bf16.mxu1 %v977_v15  ;;  %v993_v37 = vld [vmem:[#allocation2 + $0xe4] ss:$8 sps:$4 sm:$0xff]   ;;  %v1004_v38 = vld [vmem:[#allocation2 + $0x100] ss:$8 sps:$4 sm:$0xff]   ;;  %v1010_v39 = vld [vmem:[#allocation2 + $0x1b0] ss:$8 sps:$4 sm:$0xff]   ;;  %v411_v40 = vand.u32 %v1007_v34, %v406_v36 }
  0x1b   :  { %420 = vmatpush1.bf16.msra.mxu0 %v961_v11  ;;  %v997_v41 = vld [vmem:[#allocation2 + $0xe0] ss:$8 sps:$4 sm:$0xff]   ;;  %v999_v42 = vld [vmem:[#allocation2 + $0xd4] ss:$8 sps:$4 sm:$0xff]   ;;  %v408_v43 = vand.u32 %v1010_v39, %v406_v36  ;;  %v1013_v46 = vld [vmem:[#allocation2 + $0x1a4] ss:$8 sps:$4 sm:$0xff]  }
  0x1c   :  { %421 = vmatprep.subr.bf16.mxu0 %v963_v12  ;;  %v44_v44 = vld [vmem:[%s1242_s0 + $0x18] sm:$0xff]  ;;  %v1005_v50 = vld [vmem:[#allocation2 + $0xc4] ss:$8 sps:$4 sm:$0xff]   ;;  %v1016_v52 = vld [vmem:[#allocation2 + $0x1a0] ss:$8 sps:$4 sm:$0xff]   ;;  %vm723_vm4 = vcmask 523264  }
  0x1d   :  { %463 = vmatpush1.bf16.msra.mxu1 %v980_v18  ;;  %v48_v45 = vld [vmem:[%s1242_s0 + $0x38] sm:$0xff]  ;;  %v46_v51 = vld [vmem:[%s1242_s0 + $0x28] sm:$0xff]  ;;  %v43_v62 = vld [vmem:[%s1242_s0 + $0x10] sm:$0xff]  ;;  %vm815_vm7 = vcmask 23552  }
  0x1e   :  { %464 = vmatprep.subr.bf16.mxu1 %v983_v19  ;;  %v52_v47 = vpack.c.bf16 %v48_v45, %v44_v44  ;;  %v1003_v49 = vld [vmem:[#allocation2 + $0xd0] ss:$8 sps:$4 sm:$0xff]   ;;  %v50_v53 = vpack.c.bf16 %v46_v51, %v42_v48  ;;  %v1019_v54 = vld [vmem:[#allocation2 + $0x194] ss:$8 sps:$4 sm:$0xff]   ;;  %v1009_v55 = vld [vmem:[#allocation2 + $0xc0] ss:$8 sps:$4 sm:$0xff]  }
  0x1f   :  { %422 = vmatpush1.bf16.msra.mxu0 %v967_v16  ;;  %v1011_v56 = vld [vmem:[#allocation2 + $0xb4] ss:$8 sps:$4 sm:$0xff]   ;;  %v1022_v57 = vld [vmem:[#allocation2 + $0x190] ss:$8 sps:$4 sm:$0xff]   ;;  %v1025_v59 = vld [vmem:[#allocation2 + $0x184] ss:$8 sps:$4 sm:$0xff]  }
  0x20   :  { %423 = vmatprep.subr.bf16.mxu0 %v969_v17  ;;  %879 = vmatprep.mubr.msk.bf16.mxu1 %vm399_vm2, %v52_v47  ;;  %v1015_v58 = vld [vmem:[#allocation2 + $0xb0] ss:$8 sps:$4 sm:$0xff]   ;;  %v1017_v60 = vld [vmem:[#allocation2 + $0xa4] ss:$8 sps:$4 sm:$0xff]   ;;  %v1028_v61 = vld [vmem:[#allocation2 + $0x180] ss:$8 sps:$4 sm:$0xff]  }
  0x21   :  { %465 = vmatpush1.bf16.msra.mxu1 %v986_v22  ;;  %445 = vmatprep.mubr.bf16.mxu0 %v50_v53  ;;  %v47_v63 = vld [vmem:[%s1242_s0 + $0x30] sm:$0xff]  ;;  %v1032_v0 = vld [vmem:[%s1245_s3 + $0x78] sm:$0xff]   ;;  %v1021_v1 = vld [vmem:[#allocation2 + $0xa0] ss:$8 sps:$4 sm:$0xff]  }
  0x22   :  { %466 = vmatprep.subr.bf16.mxu1 %v989_v23  ;;  %v1023_v2 = vld [vmem:[#allocation2 + $0x94] ss:$8 sps:$4 sm:$0xff]   ;;  %v51_v4 = vpack.c.bf16 %v47_v63, %v43_v62  ;;  %v1027_v6 = vld [vmem:[#allocation2 + $0x90] ss:$8 sps:$4 sm:$0xff]   ;;  %v1029_v7 = vld [vmem:[#allocation2 + $0x84] ss:$8 sps:$4 sm:$0xff]  }
  0x23   :  { %424 = vmatpush1.bf16.msra.mxu0 %v973_v20  ;;  %v1033_v3 = vld [vmem:[%s1245_s3 + $0x38] sm:$0xff]   ;;  %v1034_v5 = vld [vmem:[%s1245_s3 + $0x70] sm:$0xff]   ;;  %v1036_v9 = vld [vmem:[%s1245_s3 + $0x68] sm:$0xff]  }
  0x24   :  { %425 = vmatprep.subr.bf16.mxu0 %v975_v21  ;;  %v1035_v8 = vld [vmem:[%s1245_s3 + $0x30] sm:$0xff]   ;;  %v1031_v10 = vld [vmem:[#allocation2 + $0x80] ss:$8 sps:$4 sm:$0xff]   ;;  %v1040_v17 = vld [vmem:[%s1245_s3 + $0x58] sm:$0xff]  }
  0x25   :  { %467 = vmatpush1.bf16.msra.mxu1 %v992_v26  ;;  %v41_v11 = vld [vmem:[%s1242_s0] sm:$0xff]  ;;  %v1037_v13 = vld [vmem:[%s1245_s3 + $0x28] sm:$0xff]   ;;  %v1041_v18 = vld [vmem:[%s1245_s3 + $0x18] sm:$0xff]   ;;  %v111_v26 = vlaneseq }
  0x26   :  { %468 = vmatprep.subr.bf16.mxu1 %v995_v27  ;;  %v45_v12 = vld [vmem:[%s1242_s0 + $0x20] sm:$0xff]  ;;  %v1042_v19 = vld [vmem:[%s1245_s3 + $0x50] sm:$0xff]   ;;  %v1044_v21 = vld [vmem:[%s1245_s3 + $0x48] sm:$0xff]  }
  0x27   :  { %426 = vmatpush1.bf16.msra.mxu0 %v979_v24  ;;  %v49_v14 = vpack.c.bf16 %v45_v12, %v41_v11  ;;  %v1038_v15 = vld [vmem:[%s1245_s3 + $0x60] sm:$0xff]   ;;  %v1043_v20 = vld [vmem:[%s1245_s3 + $0x10] sm:$0xff]   ;;  %v1045_v22 = vld [vmem:[%s1245_s3 + $0x8] sm:$0xff]   ;;  %v112_v27 = vshrl.u32 %v111_v26, 7 }
  0x28   :  { %427 = vmatprep.subr.bf16.mxu0 %v981_v25  ;;  %v1039_v16 = vld [vmem:[%s1245_s3 + $0x20] sm:$0xff]   ;;  %v1094_v25 = vmov 0.0  }
  0x29   :  { %469 = vmatpush1.bf16.msra.mxu1 %v998_v32  ;;  %v1046_v23 = vld [vmem:[%s1245_s3 + $0x40] sm:$0xff]   ;;  %v117_v28 = vsub.s32 1, %v112_v27 }
  0x2a   :  { %470 = vmatprep.subr.bf16.mxu1 %v1001_v33  ;;  %v1047_v24 = vld [vmem:[%s1245_s3] sm:$0xff]  }
  0x2b   :  { %428 = vmatpush1.bf16.msra.mxu0 %v985_v30  ;;  %v113_v30 = vsub.s32 0, %v112_v27  ;;  %v880_v62 = vld [vmem:[%s1246_s4] ss:$0 sm:$0xff] }
  0x2c   :  { %429 = vmatprep.subr.bf16.mxu0 %v987_v31  ;;  %v109_v31 = vld [vmem:[%s1244_s2] sm:$0x3] }
  0x2d   :  { %471 = vmatpush1.bf16.msra.mxu1 %v1004_v38  ;;  %v118_v32 = vrot.slane %v109_v31, %v117_v28  ;;  %v114_v34 = vrot.slane %v109_v31, %v113_v30 }
  0x2e   :  { %480 = vmatprep.subr.bf16.mxu1 %v411_v40 }
  0x2f   :  { %430 = vmatpush2.bf16.msra.mxu0 %v991_v35 }
  0x30   :  { %431 = vmatprep.subr.bf16.mxu0 %v993_v37 }
  0x31   :  { %481 = vmatpush2.bf16.msra.mxu1 %v408_v43 }
  0x32   :  { %482 = vmatprep.subr.bf16.mxu1 %v1013_v46 }
  0x33   :  { %432 = vmatpush2.bf16.msra.mxu0 %v997_v41 }
  0x34   :  { %433 = vmatprep.subr.bf16.mxu0 %v999_v42 }
  0x35   :  { %483 = vmatpush2.bf16.msra.mxu1 %v1016_v52 }
  0x36   :  { %484 = vmatprep.subr.bf16.mxu1 %v1019_v54 }
  0x37   :  { %434 = vmatpush2.bf16.msra.mxu0 %v1003_v49 }
  0x38   :  { %435 = vmatprep.subr.bf16.mxu0 %v1005_v50 }
  0x39   :  { %485 = vmatpush2.bf16.msra.mxu1 %v1022_v57  ;;  %v1050_v57 = vld [vmem:[%s1247_s5 + $0x8] sm:$0xff]  }
  0x3a   :  { %486 = vmatprep.subr.bf16.mxu1 %v1025_v59 }
  0x3b   :  { %436 = vmatpush2.bf16.msra.mxu0 %v1009_v55  ;;  %v1048_v55 = vld [vmem:[%s1247_s5 + $0x18] sm:$0xff]  }
  0x3c   :  { %437 = vmatprep.subr.bf16.mxu0 %v1011_v56  ;;  %v1049_v56 = vld [vmem:[%s1247_s5 + $0x10] sm:$0xff]  }
  0x3d   :  { %487 = vmatpush2.bf16.msra.mxu1 %v1028_v61 }
  0x3e   :  { %903 = vmatprep.subr.bf16.mxu1 %v1032_v0 }
  0x3f   :  { %438 = vmatpush2.bf16.msra.mxu0 %v1015_v58  ;;  %v1051_v58 = vld [vmem:[%s1247_s5] sm:$0xff]  }
  0x40   :  { %439 = vmatprep.subr.bf16.mxu0 %v1017_v60  ;;  %489 = vmatmul.mubr.bf16.vlgmr.msra.gmra.mxu1 %v51_v4 }
  0x41   :  { %904 = vmatpush3.bf16.msra.mxu1 %v1033_v3 }
  0x42   :  { %905 = vmatprep.subr.bf16.mxu1 %v1034_v5 }
  0x43   :  { %440 = vmatpush2.bf16.msra.mxu0 %v1021_v1 }
  0x44   :  { %441 = vmatprep.subr.bf16.mxu0 %v1023_v2 }
  0x45   :  { %906 = vmatpush3.bf16.msra.mxu1 %v1035_v8 }
  0x46   :  { %907 = vmatprep.subr.bf16.mxu1 %v1036_v9 }
  0x47   :  { %442 = vmatpush2.bf16.msra.mxu0 %v1027_v6 }
  0x48   :  { %443 = vmatprep.subr.bf16.mxu0 %v1029_v7  ;;  %v897_v7 = vld [vmem:[%s1248_s6] ss:$0 sm:$0xff] }
  0x49   :  { %908 = vmatpush3.bf16.msra.mxu1 %v1037_v13 }
  0x4a   :  { %909 = vmatprep.subr.bf16.mxu1 %v1038_v15 }
  0x4b   :  { %444 = vmatpush2.bf16.msra.mxu0 %v1031_v10 }
  0x4c   :  { %930 = vmatprep.subr.bf16.mxu0 %v1094_v25 }
  0x4d   :  { %910 = vmatpush3.bf16.msra.mxu1 %v1039_v16 }
  0x4e   :  { %446 = vmatmul.mubr.bf16.vlgmr.msra.gmra.mxu0 %v49_v14  ;;  %911 = vmatprep.subr.bf16.mxu1 %v1040_v17 }
  0x4f   :  { %931 = vmatpush3.bf16.msra.mxu0 %v1048_v55  ;;  %938 = vmatprep.mubr.msk.bf16.mxu0 %vm1095_vm3, %v1094_v25 }
  0x50   :  { %932 = vmatprep.subr.bf16.mxu0 %v1094_v25 }
  0x51   :  { %912 = vmatpush3.bf16.msra.mxu1 %v1041_v18 }
  0x52   :  { %913 = vmatprep.subr.bf16.mxu1 %v1042_v19 }
  0x53   :  { %933 = vmatpush3.bf16.msra.mxu0 %v1049_v56 }
  0x54   :  { %934 = vmatprep.subr.bf16.mxu0 %v1094_v25 }
  0x55   :  { %914 = vmatpush3.bf16.msra.mxu1 %v1043_v20 }
  0x56   :  { %915 = vmatprep.subr.bf16.mxu1 %v1044_v21 }
  0x57   :  { %935 = vmatpush3.bf16.msra.mxu0 %v1050_v57 }
  0x58   :  { %936 = vmatprep.subr.bf16.mxu0 %v1094_v25 }
  0x59   :  { %916 = vmatpush3.bf16.msra.mxu1 %v1045_v22 }
  0x5a   :  { %917 = vmatprep.subr.bf16.mxu1 %v1046_v23 }
  0x5b   :  { %937 = vmatpush3.bf16.msra.mxu0 %v1051_v58 }
  0x5d   :  { %918 = vmatpush3.bf16.msra.mxu1 %v1047_v24 }
 0x100   :  { %v490_v29 = vpop.f32.mrf.mxu1 }
 0x102   :  { %v492_v33 = vpop.f32.mrf.mxu1 }
 0x104   :  { %v494_v39 = vpop.f32.mrf.mxu1 }
 0x106   :  { %v496_v47 = vpop.f32.mrf.mxu1 }
 0x10e   :  { %v447_v35 = vpop.f32.mrf.mxu0 }
 0x10f   :  { %v448_v38 = vadd.f32 %v447_v35, %v114_v34 }
 0x110   :  { %v449_v36 = vpop.f32.mrf.mxu0 }
 0x111   :  { %v450_v37 = vadd.f32 %v449_v36, %v118_v32  ;;  %v491_v46 = vadd.f32 %v490_v29, %v448_v38 }
 0x112   :  { %v451_v40 = vpop.f32.mrf.mxu0 }
 0x113   :  { %v452_v41 = vadd.f32 %v451_v40, %v114_v34  ;;  %v493_v43 = vadd.f32 %v492_v33, %v450_v37  ;;  %v499_v52 = vmax.f32 %v491_v46, 0.0  ;;  %v769_v37 = vand.u32 127, %v111_v26 }
 0x114   :  { %v453_v42 = vpop.f32.mrf.mxu0 }
 0x115   :  { %v495_v44 = vadd.f32 %v494_v39, %v452_v41  ;;  %v454_v45 = vadd.f32 %v453_v42, %v118_v32  ;;  %v500_v50 = vmax.f32 %v493_v43, 0.0  ;;  %vm770_vm6 = vcmp.eq.s32.totalorder %v769_v37, 1 }
 0x117   :  { %v497_v48 = vadd.f32 %v496_v47, %v454_v45  ;;  %v501_v49 = vmax.f32 %v495_v44, 0.0 }
 0x119   :  { %v502_v51 = vmax.f32 %v497_v48, 0.0  ;;  %v503_v54 = vpack.c.bf16 %v501_v49, %v499_v52 }
 0x11b   :  { %v504_v53 = vpack.c.bf16 %v502_v51, %v500_v50 }
 0x11d   :  { %672 = vmatprep.mubr.bf16.mxu1 %v504_v53 }
 0x11e   :  { %673 = vmatmul.mubr.bf16.vlgmr.msra.gmra.mxu1 %v503_v54 }
 0x1de   :  { %v919_v59 = vpop.f32.mrf.mxu1 }
 0x1e0   :  { %v920_v60 = vpop.f32.mrf.mxu1 }
 0x1e1   :  { %v921_v61 = vadd.f32 %v920_v60, %v919_v59 }
 0x1e2   :  { %v922_v63 = vpop.f32.mrf.mxu1 }
 0x1e3   :  { %v675_v1 = vadd.f32 %v921_v61, %v880_v62 }
 0x1e4   :  { %v923_v0 = vpop.f32.mrf.mxu1 }
 0x1e5   :  { %v924_v2 = vadd.f32 %v923_v0, %v922_v63  ;;  %v681_v4 = vmax.f32 %v675_v1, 0.0 }
 0x1e7   :  { %v678_v3 = vadd.f32 %v924_v2, %v880_v62 }
 0x1e9   :  { %v682_v5 = vmax.f32 %v678_v3, 0.0 }
 0x1eb   :  { %v683_v6 = vpack.c.bf16 %v682_v5, %v681_v4 }
 0x1ed   :  { %939 = vmatmul.mubr.msk.bf16.vlgmr.msra.gmra.mxu0 %vm723_vm4, %v683_v6 }
 0x2ad   :  { %v761_v8 = vpop.f32.mrf.mxu0 }
 0x2ae   :  { %v762_v9 = vadd.f32 %v897_v7, %v761_v8 }
 0x2af   :  { %v940_v10 = vpop.f32.mrf.mxu0 }
 0x2b0   :  { %v771_v11 = vsub.f32 0.0, %v762_v9  ;;  %v785_v12 = vand.u32 2147483647, %v762_v9  ;;  %v783_v41 = vmax.f32 %v762_v9, 0.0 }
 0x2b1   :  { %v764_v13 = vpop.f32.mrf.mxu0 }
 0x2b2   :  { %v773_v14 = vmul.f32 1.442695, %v771_v11  ;;  %v787_v15 = vsub.f32 0.0, %v785_v12  ;;  %v765_v16 = vadd.f32 %v897_v7, %v764_v13 }
 0x2b3   :  { %v941_v17 = vpop.f32.mrf.mxu0 }
 0x2b4   :  { %v789_v18 = vmul.f32 1.442695, %v787_v15  ;;  %v772_v19 = vsub.f32 0.0, %v765_v16  ;;  %1052 = vpow2.f32 %v773_v14  ;;  %v786_v20 = vand.u32 2147483647, %v765_v16 }
 0x2b5   :  { %v784_v26 = vmax.f32 %v765_v16, 0.0 }
 0x2b6   :  { %1054 = vpow2.f32 %v789_v18  ;;  %v788_v21 = vsub.f32 0.0, %v786_v20  ;;  %v775_v22 = vmul.f32 1.442695, %v772_v19 }
 0x2b8   :  { %v791_v23 = vmul.f32 1.442695, %v788_v21 }
 0x2ba   :  { %1056 = vpow2.f32 %v791_v23 }
 0x2bb   :  { %1058 = vpow2.f32 %v775_v22 }
 0x2c1   :  { %v1053_v24 = vpop.eup %1052 }
 0x2c2   :  { %v777_v28 = vadd.f32 1.0, %v1053_v24 }
 0x2c3   :  { %v1055_v25 = vpop.eup %1054 }
 0x2c4   :  { %v793_v27 = vadd.f32 1.0, %v1055_v25  ;;  %v796_v32 = vmul.f32 -0.5, %v1055_v25  ;;  %v799_v35 = vand.u32 2147483647, %v1055_v25 }
 0x2c6   :  { %1060 = vlog2.f32 %v793_v27  ;;  %v797_v34 = vadd.f32 1.0, %v796_v32  ;;  %vm800_vm5 = vcmp.lt.f32.partialorder %v799_v35, 0.0004427343 }
 0x2c7   :  { %v1057_v29 = vpop.eup %1056  ;;  %1062 = vrcp.f32 %v777_v28 }
 0x2c8   :  { %v1059_v30 = vpop.eup %1058  ;;  %v802_v31 = vadd.f32 1.0, %v1057_v29  ;;  %v805_v36 = vmul.f32 -0.5, %v1057_v29  ;;  %v798_v40 = vmul.f32 %v1055_v25, %v797_v34  ;;  %v808_v44 = vand.u32 2147483647, %v1057_v29 }
 0x2c9   :  { %v778_v33 = vadd.f32 1.0, %v1059_v30 }
 0x2ca   :  { %1064 = vlog2.f32 %v802_v31  ;;  %v806_v42 = vadd.f32 1.0, %v805_v36  ;;  %vm809_vm8 = vcmp.lt.f32.partialorder %v808_v44, 0.0004427343 }
 0x2cb   :  { %1066 = vrcp.f32 %v778_v33 }
 0x2cc   :  { %v807_v50 = vmul.f32 %v1057_v29, %v806_v42 }
 0x2d3   :  { %v1061_v38 = vpop.eup %1060 }
 0x2d4   :  { %v795_v39 = vmul.f32 0.6931472, %v1061_v38  ;;  %v1063_v45 = vpop.eup %1062 }
 0x2d6   :  { %v801_v43 = vsel %vm800_vm5, %v798_v40, %v795_v39 }
 0x2d7   :  { %v811_v46 = vadd.f32 %v801_v43, %v783_v41  ;;  %v1065_v47 = vpop.eup %1064 }
 0x2d8   :  { %v804_v49 = vmul.f32 0.6931472, %v1065_v47  ;;  %v1067_v53 = vpop.eup %1066 }
 0x2d9   :  { %v813_v48 = vsel %vm770_vm6, %v1063_v45, %v811_v46 }
 0x2da   :  { %816 = vst.msk [vmem:[%s1249_s7] sm:$0xff] %vm815_vm7, %v813_v48  ;;  %v810_v51 = vsel %vm809_vm8, %v807_v50, %v804_v49 }
 0x2db   :  { %v812_v52 = vadd.f32 %v810_v51, %v784_v26 }
 0x2dd   :  { %v814_v54 = vsel %vm770_vm6, %v1067_v53, %v812_v52 }
 0x2de   :  { %817 = vst.msk [vmem:[%s1249_s7 + $0x8] sm:$0xff] %vm815_vm7, %v814_v54 }
 0x2df   :  { %822 = vsyncpa [#allocation3], 1 }

</bundles_post_ra>
